<compile_context>
chip_gen: v7x
topology: tpu7x:2x2x1
jax: 0.10.0
libtpu: 0.0.40
codegen_flags: <defaults>
</compile_context>

<pallas_src>
import math

import jax
import jax.numpy as jnp
from jax import lax
from jax.experimental import pallas as pl
from jax.experimental.pallas import tpu as pltpu

DIMS = [8, 32, 32, 32, 16, 4]
SKIP = len(DIMS) // 2          # = 3
NEG_SLOPE = 0.01               # nn.LeakyReLU default

D0, D1, D2, D3, D4, D5 = DIMS


def _round_up(a, b):
    return (a + b - 1) // b * b


def _cdiv(a, b):
    return -(-a // b)


# ---- packed transposed-weight slab layout (rows = out_features) -------------
#   rows OX      : OX+D1      -> W1^T  (D1, D0)  \  merged K=D0 matmul vs x
#   rows OX+D1   : OX+NX      -> W3b^T (D4, D0)  /  (layer-3 x-branch of concat)
#   rows O2      : O2+D2      -> W2^T  (D2, D1)
#   rows O3A     : O3A+D4     -> W3a^T (D4, D3)
#   rows O4      : O4+D5      -> W4^T  (D5, D4)
OX = 0
NX = D1 + D4                    # 48 rows sharing the x contraction (K = D0)
O2 = OX + NX                    # 48
O3A = O2 + D2                   # 80
O4 = O3A + D4                   # 96
WROWS = _round_up(O4 + D5, 8)   # 104
WCOLS = max(D0, D1, D3, D4)     # 32

B1O = 0
B2O = B1O + D1                  # 32
B3O = B2O + D2                  # 64
B4O = B3O + D4                  # 80
BROWS = _round_up(B4O + D5, 8)  # 88


def _leaky(v):
    # LeakyReLU(0.01) == max(v, 0.01*v) for 0 < slope < 1  (mul+max, no select).
    return jnp.maximum(v, NEG_SLOPE * v)


def mlp_kernel(x_ref, wp_ref, bp_ref, ot_ref):
    # x_ref : (tm, D0)        raw batch-major tile (no host transpose / pad)
    # wp_ref: (WROWS, WCOLS)  packed transposed weights (constant index -> resident)
    # bp_ref: (BROWS, 1)      packed f32 biases (column vectors -> lane broadcast)
    # ot_ref: (D5, tm)        lane-dense transposed output tile
    cdt = wp_ref.dtype
    x = x_ref[...]

    wx   = wp_ref[OX:OX + NX, :D0]      # [W1^T ; W3b^T]  (48, 8)
    w2t  = wp_ref[O2:O2 + D2, :D1]      # (32, 32)
    w3at = wp_ref[O3A:O3A + D4, :D3]    # (16, 32)
    w4t  = wp_ref[O4:O4 + D5, :D4]      # (4, 16)

    b1 = bp_ref[B1O:B1O + D1, :]        # (32, 1)
    b2 = bp_ref[B2O:B2O + D2, :]        # (32, 1)
    b3 = bp_ref[B3O:B3O + D4, :]        # (16, 1)
    b4 = bp_ref[B4O:B4O + D5, :]        # (4, 1)

    # One merged MXU pass for both matmuls that contract against x:
    #   pre_x = [W1^T ; W3b^T] @ x^T   (48, tm)
    # The x transpose is folded into the contraction (last axes of both operands),
    # so the wrapper never materializes x^T in HBM.
    pre_x = lax.dot_general(wx, x.astype(cdt), (((1,), (1,)), ((), ())),
                            preferred_element_type=jnp.float32)          # (48, tm)

    h = _leaky(pre_x[:D1, :] + b1)                                        # (32, tm) layers1[0]
    xbr = pre_x[D1:D1 + D4, :]                                            # (16, tm) held for layer 3

    h = _leaky(jnp.dot(w2t, h.astype(cdt),
                       preferred_element_type=jnp.float32) + b2)          # (32, tm) layers1[1]

    # y = cat([h, x], dim=1); layers2[0]  ==  W3a^T @ h^T + W3b^T @ x^T + b3
    h = _leaky(jnp.dot(w3at, h.astype(cdt),
                       preferred_element_type=jnp.float32) + xbr + b3)    # (16, tm)

    # layers2[-1]: final Linear, no activation (last_op = None)
    out = jnp.dot(w4t, h.astype(cdt),
                  preferred_element_type=jnp.float32) + b4                # (4, tm)
    ot_ref[...] = out.astype(ot_ref.dtype)


def init_params(key, dims=DIMS):
    """Deterministic PyTorch-style Linear init: U(-1/sqrt(fan_in), 1/sqrt(fan_in))."""
    def linear(k, din, dout):
        k1, k2 = jax.random.split(k)
        bound = 1.0 / math.sqrt(din)
        w = jax.random.uniform(k1, (din, dout), jnp.float32, -bound, bound)
        b = jax.random.uniform(k2, (1, dout), jnp.float32, -bound, bound)
        return w, b

    keys = jax.random.split(key, 4)
    w1, b1 = linear(keys[0], dims[0], dims[1])                      # layers1[0]
    w2, b2 = linear(keys[1], dims[1], dims[2])                      # layers1[1]
    w3, b3 = linear(keys[2], dims[SKIP] + dims[0], dims[SKIP + 1])  # layers2[0]
    w4, b4 = linear(keys[3], dims[-2], dims[-1])                    # layers2[-1]
    # Split the concat-facing weight: first dims[SKIP] rows act on y, rest on x.
    w3a, w3b = w3[: dims[SKIP]], w3[dims[SKIP]:]
    return (w1, b1, w2, b2, w3a, w3b, b3, w4, b4)


def pack_params(params, dtype=jnp.float32):
    """Pack all transposed weights into one slab and all biases into another (one-time)."""
    w1, b1, w2, b2, w3a, w3b, b3, w4, b4 = params
    wpack = jnp.zeros((WROWS, WCOLS), dtype)
    wpack = wpack.at[OX:OX + D1, :D0].set(w1.T.astype(dtype))
    wpack = wpack.at[OX + D1:OX + NX, :D0].set(w3b.T.astype(dtype))
    wpack = wpack.at[O2:O2 + D2, :D1].set(w2.T.astype(dtype))
    wpack = wpack.at[O3A:O3A + D4, :D3].set(w3a.T.astype(dtype))
    wpack = wpack.at[O4:O4 + D5, :D4].set(w4.T.astype(dtype))

    bpack = jnp.zeros((BROWS, 1), jnp.float32)        # biases always f32
    bpack = bpack.at[B1O:B1O + D1, 0].set(b1.reshape(-1))
    bpack = bpack.at[B2O:B2O + D2, 0].set(b2.reshape(-1))
    bpack = bpack.at[B3O:B3O + D4, 0].set(b3.reshape(-1))
    bpack = bpack.at[B4O:B4O + D5, 0].set(b4.reshape(-1))
    return wpack, bpack


def _num_tensorcores():
    """v7x has 2 TensorCores per chip (grid sharded across them); v5e/v6e have 1."""
    try:
        kind = jax.devices()[0].device_kind.lower()
    except Exception:
        return 1
    return 2 if "v7" in kind else 1


def _choose_tiling(n, tm, num_cores):
    """Batch tile (multiple of 128) and padded batch for the grid.

    Single-TC chips keep one big tile (no forced split = no extra per-step
    overhead); on 2-TC chips the step count is rounded to a multiple of the
    core count for balanced occupancy.
    """
    n128 = _round_up(max(n, 1), 128)
    tm_eff = min(_round_up(tm, 128), n128)
    if num_cores > 1 and n128 >= num_cores * 128:
        steps = _round_up(_cdiv(n128, tm_eff), num_cores)
        tm_eff = _round_up(_cdiv(n128, steps), 128)
    n_pad = _round_up(n128, tm_eff)
    return tm_eff, n_pad


def mlp_pallas(x, packed_params, *, tm=8192):
    """x: (N, dims[0]) -> (N, dims[-1]) f32, matching MLP.forward (skip branch, last_op=None)."""
    wpack, bpack = packed_params
    n, d0 = x.shape
    assert d0 == D0
    tm_eff, n_pad = _choose_tiling(n, tm, _num_tensorcores())
    grid = (n_pad // tm_eff,)

    out_t = pl.pallas_call(
        mlp_kernel,
        out_shape=jax.ShapeDtypeStruct((D5, n_pad), jnp.float32),
        grid_spec=pltpu.PrefetchScalarGridSpec(
            num_scalar_prefetch=0,
            grid=grid,
            in_specs=[
                # Raw x tile; the last block may read past N (garbage tail is
                # column-confined and sliced off after the call).
                pl.BlockSpec((tm_eff, D0), lambda i: (i, 0)),
                pl.BlockSpec((WROWS, WCOLS), lambda i: (0, 0)),   # packed weights (resident)
                pl.BlockSpec((BROWS, 1), lambda i: (0, 0)),       # packed biases (resident)
            ],
            out_specs=pl.BlockSpec((D5, tm_eff), lambda i: (0, i)),  # lane-dense out^T
        ),
        compiler_params=pltpu.CompilerParams(
            dimension_semantics=("parallel",),
            vmem_limit_bytes=32 * 1024 * 1024,
        ),
    )(x.astype(wpack.dtype), wpack, bpack)

    # (D5, n_pad) -> (N, D5): tiny 4-row XLA transpose.
    return out_t[:, :n].T


def mlp_reference(x, params):
    """Exact-f32 reference of the PyTorch forward (VPU broadcast+sum, no MXU),
    so it is independent of TPU matmul precision defaults."""
    w1, b1, w2, b2, w3a, w3b, b3, w4, b4 = params

    def dense(a, w, b):
        return (a[:, :, None] * w[None, :, :]).sum(axis=1) + b

    y = _leaky(dense(x, w1, b1))
    y = _leaky(dense(y, w2, b2))
    # torch.cat([y, x], dim=1) then Linear == y @ w3a + x @ w3b + b3
    y = _leaky(dense(y, w3a, b3) + (x[:, :, None] * w3b[None, :, :]).sum(axis=1))
    y = dense(y, w4, b4)
    return y


if __name__ == "__main__":
    key = jax.random.PRNGKey(0)
    kx, kp = jax.random.split(key)

    # Ragged batch (not a multiple of 128) exercises the ragged-tail grid path.
    N = 200
    x = jax.random.normal(kx, (N, DIMS[0]), jnp.float32)
    params = init_params(kp)
    packed = pack_params(params)                 # f32 operands for parity

    out = jax.block_until_ready(mlp_pallas(x, packed))
    ref = mlp_reference(x, params)

    assert out.shape == (N, DIMS[-1])
    # Tolerance covers the MXU's reduced-precision f32 passes at default precision.
    # TODO(synk): pass precision=HIGHEST (or bf16 operands) once the deployment's
    # accuracy/speed choice is fixed, and tighten this tolerance accordingly.
    assert jnp.allclose(out, ref, atol=2e-2, rtol=2e-2), float(jnp.max(jnp.abs(out - ref)))
    print("KERNEL_OK")
</pallas_src>

<mosaic_0001>
module attributes {stable_mosaic.version = 11 : i64} {
  func.func @mlp_kernel(%arg0: i32, %arg1: memref<256x8xf32, #tpu.memory_space<vmem>>, %arg2: memref<104x32xf32, #tpu.memory_space<vmem>>, %arg3: memref<88x1xf32, #tpu.memory_space<vmem>>, %arg4: memref<4x256xf32, #tpu.memory_space<vmem>>) attributes {dimension_semantics = [#tpu.dimension_semantics<parallel>], iteration_bounds = array<i64: 1>, scalar_prefetch = 0 : i64, scratch_operands = 0 : i64, tpu.core_type = #tpu.core_type<tc>, window_params = [{transform_indices = @transform_0, window_bounds = array<i64: 256, 8>}, {pipeline_mode = #tpu.pipeline_mode<synchronous>, transform_indices = @transform_1, window_bounds = array<i64: 104, 32>}, {pipeline_mode = #tpu.pipeline_mode<synchronous>, transform_indices = @transform_2, window_bounds = array<i64: 88, 1>}, {transform_indices = @transform_3, window_bounds = array<i64: 4, 256>}]} {
    %c0 = arith.constant 0 : index
    %c0_0 = arith.constant 0 : index
    %0 = vector.load %arg1[%c0, %c0_0] : memref<256x8xf32, #tpu.memory_space<vmem>>, vector<256x8xf32>
    %c0_1 = arith.constant 0 : index
    %c0_2 = arith.constant 0 : index
    %1 = vector.load %arg2[%c0_1, %c0_2] : memref<104x32xf32, #tpu.memory_space<vmem>>, vector<48x8xf32>
    %c48 = arith.constant 48 : index
    %c0_3 = arith.constant 0 : index
    %2 = vector.load %arg2[%c48, %c0_3] : memref<104x32xf32, #tpu.memory_space<vmem>>, vector<32x32xf32>
    %c80 = arith.constant 80 : index
    %c0_4 = arith.constant 0 : index
    %3 = vector.load %arg2[%c80, %c0_4] : memref<104x32xf32, #tpu.memory_space<vmem>>, vector<16x32xf32>
    %c96 = arith.constant 96 : index
    %c0_5 = arith.constant 0 : index
    %4 = vector.load %arg2[%c96, %c0_5] : memref<104x32xf32, #tpu.memory_space<vmem>>, vector<4x16xf32>
    %c0_6 = arith.constant 0 : index
    %c0_7 = arith.constant 0 : index
    %5 = vector.load %arg3[%c0_6, %c0_7] : memref<88x1xf32, #tpu.memory_space<vmem>>, vector<32x1xf32>
    %c32 = arith.constant 32 : index
    %c0_8 = arith.constant 0 : index
    %6 = vector.load %arg3[%c32, %c0_8] : memref<88x1xf32, #tpu.memory_space<vmem>>, vector<32x1xf32>
    %c64 = arith.constant 64 : index
    %c0_9 = arith.constant 0 : index
    %7 = vector.load %arg3[%c64, %c0_9] : memref<88x1xf32, #tpu.memory_space<vmem>>, vector<16x1xf32>
    %c80_10 = arith.constant 80 : index
    %c0_11 = arith.constant 0 : index
    %8 = vector.load %arg3[%c80_10, %c0_11] : memref<88x1xf32, #tpu.memory_space<vmem>>, vector<4x1xf32>
    %cst = arith.constant dense<0.000000e+00> : vector<48x256xf32>
    %9 = tpu.matmul %1, %0, %cst {dimension_numbers = #tpu.dot_dimension_numbers<[1], [1], [0], [0], [0, 0, 1, 0], [], []>} : vector<48x8xf32>, vector<256x8xf32>, vector<48x256xf32> -> vector<48x256xf32>
    %10 = vector.extract_strided_slice %9 {offsets = [0, 0], sizes = [32, 256], strides = [1, 1]} : vector<48x256xf32> to vector<32x256xf32>
    %11 = vector.broadcast %5 : vector<32x1xf32> to vector<32x256xf32>
    %12 = arith.addf %10, %11 : vector<32x256xf32>
    %cst_12 = arith.constant 0.00999999977 : f32
    %13 = vector.broadcast %cst_12 : f32 to vector<32x256xf32>
    %14 = arith.mulf %13, %12 : vector<32x256xf32>
    %15 = arith.maximumf %12, %14 : vector<32x256xf32>
    %16 = vector.extract_strided_slice %9 {offsets = [32, 0], sizes = [16, 256], strides = [1, 1]} : vector<48x256xf32> to vector<16x256xf32>
    %cst_13 = arith.constant dense<0.000000e+00> : vector<32x256xf32>
    %17 = tpu.matmul %2, %15, %cst_13 {dimension_numbers = #tpu.dot_dimension_numbers<[1], [0], [0], [1], [0, 0, 1, 1], [], []>} : vector<32x32xf32>, vector<32x256xf32>, vector<32x256xf32> -> vector<32x256xf32>
    %18 = vector.broadcast %6 : vector<32x1xf32> to vector<32x256xf32>
    %19 = arith.addf %17, %18 : vector<32x256xf32>
    %cst_14 = arith.constant 0.00999999977 : f32
    %20 = vector.broadcast %cst_14 : f32 to vector<32x256xf32>
    %21 = arith.mulf %20, %19 : vector<32x256xf32>
    %22 = arith.maximumf %19, %21 : vector<32x256xf32>
    %cst_15 = arith.constant dense<0.000000e+00> : vector<16x256xf32>
    %23 = tpu.matmul %3, %22, %cst_15 {dimension_numbers = #tpu.dot_dimension_numbers<[1], [0], [0], [1], [0, 0, 1, 1], [], []>} : vector<16x32xf32>, vector<32x256xf32>, vector<16x256xf32> -> vector<16x256xf32>
    %24 = arith.addf %23, %16 : vector<16x256xf32>
    %25 = vector.broadcast %7 : vector<16x1xf32> to vector<16x256xf32>
    %26 = arith.addf %24, %25 : vector<16x256xf32>
    %cst_16 = arith.constant 0.00999999977 : f32
    %27 = vector.broadcast %cst_16 : f32 to vector<16x256xf32>
    %28 = arith.mulf %27, %26 : vector<16x256xf32>
    %29 = arith.maximumf %26, %28 : vector<16x256xf32>
    %cst_17 = arith.constant dense<0.000000e+00> : vector<4x256xf32>
    %30 = tpu.matmul %4, %29, %cst_17 {dimension_numbers = #tpu.dot_dimension_numbers<[1], [0], [0], [1], [0, 0, 1, 1], [], []>} : vector<4x16xf32>, vector<16x256xf32>, vector<4x256xf32> -> vector<4x256xf32>
    %31 = vector.broadcast %8 : vector<4x1xf32> to vector<4x256xf32>
    %32 = arith.addf %30, %31 : vector<4x256xf32>
    %c0_18 = arith.constant 0 : index
    %c0_19 = arith.constant 0 : index
    %33 = vector.load %arg4[%c0_18, %c0_19] : memref<4x256xf32, #tpu.memory_space<vmem>>, vector<4x256xf32>
    tpu.vector_store %arg4[%c0_18, %c0_19], %32 {strides = array<i32>} : memref<4x256xf32, #tpu.memory_space<vmem>>, vector<4x256xf32>,
    return
  }
  func.func @transform_0(%arg0: i32) -> (i32, i32) {
    %c0_i32 = arith.constant 0 : i32
    %c0_i32_0 = arith.constant 0 : i32
    return %arg0, %c0_i32 : i32, i32
  }
  func.func @transform_1(%arg0: i32) -> (i32, i32) {
    %c0_i32 = arith.constant 0 : i32
    %c0_i32_0 = arith.constant 0 : i32
    %c0_i32_1 = arith.constant 0 : i32
    return %c0_i32, %c0_i32_0 : i32, i32
  }
  func.func @transform_2(%arg0: i32) -> (i32, i32) {
    %c0_i32 = arith.constant 0 : i32
    %c0_i32_0 = arith.constant 0 : i32
    %c0_i32_1 = arith.constant 0 : i32
    return %c0_i32, %c0_i32_0 : i32, i32
  }
  func.func @transform_3(%arg0: i32) -> (i32, i32) {
    %c0_i32 = arith.constant 0 : i32
    %c0_i32_0 = arith.constant 0 : i32
    return %c0_i32, %arg0 : i32, i32
  }
}

</mosaic_0001>

<bundles_post_ra>
// kernel: tpu_custom_call.1
= control target key start
LH: loop header
LB: loop body
LE: loop exit
PB: predicated region body
PF: predicated region fallthrough
CT: control target
= control target key end

     0   :  { %vm71_vm0 = vcmask 64512   ;;  %v863_v7 = vmov 0   ;;  %s1133_s0 = inlined_call_operand.vmem [shape: f32[200,8], index: 0, kind: input, shape index: {}]   ;;  %s1134_s1 = inlined_call_operand.vmem [shape: f32[104,32], index: 1, kind: input, shape index: {}]   ;;  %s1135_s2 = inlined_call_operand.vmem [shape: f32[88,1], index: 2, kind: input, shape index: {}]   ;;  %s1136_s3 = inlined_call_operand.hbm [shape: f32[4,256], index: 3, kind: output, shape index: {}]  }
   0x1   :  { %v31_v0 = vld [vmem:[%s1133_s0 + $0x80] sm:$0xff]  ;;  %v32_v1 = vld [vmem:[%s1133_s0 + $0x88] sm:$0xff]  ;;  %vm897_vm1 = vmpackc.low %vm71_vm0, %vm71_vm0  ;;  %837 = vset.pattern.permute.xlu0 %v863_v7  ;;  %838 = vset.pattern.permute.xlu1 %v863_v7 }
   0x2   :  { %v15_v2 = vld [vmem:[%s1133_s0] sm:$0xff]  ;;  %v762_v3 = vpack.c.bf16 %v32_v1, %v31_v0  ;;  %v16_v5 = vld [vmem:[%s1133_s0 + $0x8] sm:$0xff]  ;;  %v33_v6 = vld [vmem:[%s1133_s0 + $0x90] sm:$0xff] }
   0x3   :  { %v765_v8 = vpack.c.bf16 %v16_v5, %v15_v2  ;;  %v34_v9 = vld [vmem:[%s1133_s0 + $0x98] sm:$0xff]  ;;  %v17_v11 = vld [vmem:[%s1133_s0 + $0x10] sm:$0xff]  ;;  %v35_v13 = vld [vmem:[%s1133_s0 + $0xa0] sm:$0xff] }
   0x4   :  { %764 = vmatprep.subr.msk.bf16.mxu0 %vm897_vm1, %v762_v3  ;;  %v768_v10 = vpack.c.bf16 %v34_v9, %v33_v6  ;;  %v18_v12 = vld [vmem:[%s1133_s0 + $0x18] sm:$0xff]  ;;  %v36_v14 = vld [vmem:[%s1133_s0 + $0xa8] sm:$0xff]  ;;  %v931_v17 = vld [vmem:[%s1134_s1] sm:$0xff] }
   0x5   :  { %767 = vmatpush3.bf16.xpose.msk.msra.mxu0 %vm897_vm1, %v765_v8  ;;  %v771_v15 = vpack.c.bf16 %v18_v12, %v17_v11  ;;  %v774_v16 = vpack.c.bf16 %v36_v14, %v35_v13  ;;  %750 = vmatprep.mubr.msk.f32.mxu0 %vm71_vm0, %v931_v17  ;;  %v60_v18 = vld [vmem:[%s1135_s2] sm:$0xff]  ;;  %v20_v20 = vld [vmem:[%s1133_s0 + $0x28] sm:$0xff]  ;;  %v62_v21 = vld [vmem:[%s1135_s2 + $0x10] sm:$0xff] }
   0x6   :  { %770 = vmatprep.subr.msk.bf16.mxu0 %vm897_vm1, %v768_v10  ;;  %v19_v19 = vld [vmem:[%s1133_s0 + $0x20] sm:$0xff]  ;;  %289 = vperm.xlu0 %837, %v60_v18   ;;  %v37_v22 = vld [vmem:[%s1133_s0 + $0xb0] sm:$0xff]  ;;  %v38_v23 = vld [vmem:[%s1133_s0 + $0xb8] sm:$0xff] }
   0x7   :  { %v61_v24 = vld [vmem:[%s1135_s2 + $0x8] sm:$0xff]  ;;  %299 = vperm.xlu1 %838, %v62_v21   ;;  %v63_v25 = vld [vmem:[%s1135_s2 + $0x18] sm:$0xff]  ;;  %v777_v26 = vpack.c.bf16 %v20_v20, %v19_v19 }
   0xd   :  { %773 = vmatpush3.bf16.xpose.msk.msra.mxu0 %vm897_vm1, %v771_v15 }
   0xe   :  { %776 = vmatprep.subr.msk.bf16.mxu0 %vm897_vm1, %v774_v16 }
   0xf   :  { %8 = vsyncpa [#allocation3], 0  ;;  %v780_v27 = vpack.c.bf16 %v38_v23, %v37_v22  ;;  %294 = vperm.xlu0 %837, %v61_v24   ;;  %v64_v28 = vld [vmem:[%s1135_s2 + $0x20] sm:$0xff]  ;;  %304 = vperm.xlu1 %838, %v63_v25   ;;  %v65_v29 = vld [vmem:[%s1135_s2 + $0x28] sm:$0xff]  ;;  %v864_v1 = vmov 0.0   ;;  %vm351_vm2 = vcmask 261120  }
  0x10   :  { %v21_v30 = vld [vmem:[%s1133_s0 + $0x30] sm:$0xff]  ;;  %v22_v31 = vld [vmem:[%s1133_s0 + $0x38] sm:$0xff]  ;;  %v39_v32 = vld [vmem:[%s1133_s0 + $0xc0] sm:$0xff]  ;;  %428 = vmatprep.mubr.f32.mxu1 %v864_v1  ;;  %vm579_vm3 = vcmask 130048   ;;  %s865_s13 = smov [#allocation2]  }
  0x11   :  { %v40_v33 = vld [vmem:[%s1133_s0 + $0xc8] sm:$0xff]  ;;  %v66_v34 = vld [vmem:[%s1135_s2 + $0x30] sm:$0xff]  ;;  %v67_v35 = vld [vmem:[%s1135_s2 + $0x38] sm:$0xff]  ;;  %v783_v36 = vpack.c.bf16 %v22_v31, %v21_v30  ;;  %s665_s14 = sshll.u32 %s865_s13, 4  ;;  %s666_s14 = int_to_ptr.vmem [resolvable:$true] %s665_s14 }
  0x12   :  { %v786_v37 = vpack.c.bf16 %v40_v33, %v39_v32  ;;  %v68_v38 = vld [vmem:[%s1135_s2 + $0x40] sm:$0xff]  ;;  %v69_v39 = vld [vmem:[%s1135_s2 + $0x48] sm:$0xff]  ;;  %v41_v42 = vld [vmem:[%s1133_s0 + $0xd0] sm:$0xff]  ;;  %s839_s15 = scalar_lea.vmem %s666_s14, 128  ;;  %p844_p1 = scmp.lt.s32.totalorder %s666_s14, %s666_s14 }
  0x13   :  { %333 = vperm.xlu0 %837, %v64_v28   ;;  %338 = vperm.xlu1 %838, %v65_v29   ;;  %v23_v40 = vld [vmem:[%s1133_s0 + $0x40] sm:$0xff]  ;;  %v24_v41 = vld [vmem:[%s1133_s0 + $0x48] sm:$0xff]  ;;  %v42_v43 = vld [vmem:[%s1133_s0 + $0xd8] sm:$0xff]  ;;  %p840_p0 = scmp.ne.s32.totalorder %s666_s14, %s839_s15  ;;  %p845_p2 = scmp.lt.s32.totalorder %s839_s15, %s839_s15 }
  0x14   :  { %v70_v44 = vld [vmem:[%s1135_s2 + $0x50] sm:$0xf]  ;;  %v789_v45 = vpack.c.bf16 %v24_v41, %v23_v40  ;;  %v792_v46 = vpack.c.bf16 %v42_v43, %v41_v42  ;;  %v26_v48 = vld [vmem:[%s1133_s0 + $0x58] sm:$0xff]  ;;  %v43_v49 = vld [vmem:[%s1133_s0 + $0xe0] sm:$0xff] }
  0x15   :  { %779 = vmatpush3.bf16.xpose.msk.msra.mxu0 %vm897_vm1, %v777_v26  ;;  %v25_v47 = vld [vmem:[%s1133_s0 + $0x50] sm:$0xff]  ;;  %v44_v50 = vld [vmem:[%s1133_s0 + $0xe8] sm:$0xff]  ;;  %v27_v53 = vld [vmem:[%s1133_s0 + $0x60] sm:$0xff]  ;;  %p846_p3 = por %p845_p2, %p844_p1 }
  0x16   :  { %782 = vmatprep.subr.msk.bf16.mxu0 %vm897_vm1, %v780_v27  ;;  %v795_v51 = vpack.c.bf16 %v26_v48, %v25_v47  ;;  %v798_v52 = vpack.c.bf16 %v44_v50, %v43_v49  ;;  %v28_v54 = vld [vmem:[%s1133_s0 + $0x68] sm:$0xff]  ;;  %v45_v55 = vld [vmem:[%s1133_s0 + $0xf0] sm:$0xff]  ;;  %v46_v56 = vld [vmem:[%s1133_s0 + $0xf8] sm:$0xff] }
  0x17   :  { %343 = vperm.xlu0 %837, %v66_v34   ;;  %348 = vperm.xlu1 %838, %v67_v35   ;;  %v801_v57 = vpack.c.bf16 %v28_v54, %v27_v53  ;;  %v804_v58 = vpack.c.bf16 %v46_v56, %v45_v55  ;;  %v29_v59 = vld [vmem:[%s1133_s0 + $0x70] sm:$0xff]  ;;  %v30_v60 = vld [vmem:[%s1133_s0 + $0x78] sm:$0xff]  ;;  %v48_v62 = vld [vmem:[%s1134_s1 + $0x8] sm:$0xff]  ;;  %p847_p4 = pnand %p846_p3, %p840_p0 }
  0x18   :  { %v807_v61 = vpack.c.bf16 %v30_v60, %v29_v59  ;;  %v49_v63 = vld [vmem:[%s1134_s1 + $0x10] sm:$0xff]  ;;  %v50_v0 = vld [vmem:[%s1134_s1 + $0x18] sm:$0xff]  ;;  %v52_v47 = vld [vmem:[%s1134_s1 + $0x28] sm:$0xff] }
  0x19   :  { %v53_v42 = vld [vmem:[%s1134_s1 + $0x30] sm:$0xff]  ;;  %v54_v43 = vld [vmem:[%s1134_s1 + $0x38] sm:$0xff] }
  0x1b   :  { %554 = vperm.xlu0 %837, %v68_v38   ;;  %559 = vperm.xlu1 %838, %v69_v39  }
  0x1d   :  { %785 = vmatpush3.bf16.xpose.msk.msra.mxu0 %vm897_vm1, %v783_v36 }
  0x1e   :  { %788 = vmatprep.subr.msk.bf16.mxu0 %vm897_vm1, %v786_v37 }
  0x1f   :  { %576 = vperm.xlu0 %837, %v70_v44   ;;  %v55_v44 = vld [vmem:[%s1134_s1 + $0x40] sm:$0xff] }
  0x25   :  { %791 = vmatpush3.bf16.xpose.msk.msra.mxu0 %vm897_vm1, %v789_v45  ;;  %v56_v45 = vld [vmem:[%s1134_s1 + $0x48] sm:$0xff] }
  0x26   :  { %794 = vmatprep.subr.msk.bf16.mxu0 %vm897_vm1, %v792_v46  ;;  %v51_v46 = vld [vmem:[%s1134_s1 + $0x20] sm:$0xff] }
  0x2d   :  { %797 = vmatpush3.bf16.xpose.msk.msra.mxu0 %vm897_vm1, %v795_v51 }
  0x2e   :  { %800 = vmatprep.subr.msk.bf16.mxu0 %vm897_vm1, %v798_v52 }
  0x35   :  { %803 = vmatpush3.bf16.xpose.msk.msra.mxu0 %vm897_vm1, %v801_v57 }
  0x36   :  { %806 = vmatprep.subr.msk.bf16.mxu0 %vm897_vm1, %v804_v58 }
  0x3d   :  { %809 = vmatpush3.bf16.xpose.msk.msra.mxu0 %vm897_vm1, %v807_v61 }
  0x44   :  { %751 = vmatmul.mubr.msk.f32.vlgmr.msra.gmra.mrb[0].mxu0 %vm71_vm0, %v931_v17 }
  0x45   :  { %752 = vmatprep.mubr.msk.f32.mxu0 %vm71_vm0, %v48_v62 }
  0x48   :  { %753 = vmatmul.mubr.msk.f32.gmra.mrb[2].mxu0 %vm71_vm0, %v48_v62 }
  0x49   :  { %754 = vmatprep.mubr.msk.f32.mxu0 %vm71_vm0, %v49_v63 }
  0x4c   :  { %755 = vmatmul.mubr.msk.f32.gmra.mrb[4].mxu0 %vm71_vm0, %v49_v63 }
  0x4d   :  { %756 = vmatprep.mubr.msk.f32.mxu0 %vm71_vm0, %v50_v0 }
  0x50   :  { %757 = vmatmul.mubr.msk.f32.gmra.mrb[6].mxu0 %vm71_vm0, %v50_v0 }
  0x51   :  { %758 = vmatprep.mubr.msk.f32.mxu0 %vm71_vm0, %v51_v46 }
  0x54   :  { %759 = vmatmul.mubr.msk.f32.gmra.mrb[8].mxu0 %vm71_vm0, %v51_v46 }
  0x55   :  { %760 = vmatprep.mubr.msk.f32.mxu0 %vm71_vm0, %v52_v47 }
  0x58   :  { %761 = vmatmul.mubr.msk.f32.gmra.mrb[10].mxu0 %vm71_vm0, %v52_v47 }
  0x85   :  { %v290_v2 = vpop.permute.xlu0 %289 }
  0x86   :  { %v300_v12 = vpop.permute.xlu1 %299 }
  0x8e   :  { %v295_v7 = vpop.permute.xlu0 %294  ;;  %v305_v26 = vpop.permute.xlu1 %304 }
  0x92   :  { %v334_v48 = vpop.permute.xlu0 %333  ;;  %v339_v53 = vpop.permute.xlu1 %338 }
  0x96   :  { %v344_v61 = vpop.permute.xlu0 %343 }
 0x117   :  { %v252_v3 = vpop.f32.mrb[0].mxu0 }
 0x118   :  { %v307_v4 = vadd.f32 %v290_v2, %v252_v3  ;;  %v254_v5 = vpop.f32.mrb[1].mxu0 }
 0x119   :  { %v308_v6 = vadd.f32 %v290_v2, %v254_v5 }
 0x11a   :  { %v315_v9 = vmul.f32 0.01, %v307_v4 }
 0x11b   :  { %v258_v8 = vpop.f32.mrb[2].mxu0  ;;  %v316_v13 = vmul.f32 0.01, %v308_v6 }
 0x11c   :  { %v309_v10 = vadd.f32 %v295_v7, %v258_v8  ;;  %v260_v11 = vpop.f32.mrb[3].mxu0  ;;  %v323_v18 = vmax.f32 %v307_v4, %v315_v9  ;;  %v349_v9 = vpop.permute.xlu1 %348 }
 0x11d   :  { %v310_v14 = vadd.f32 %v295_v7, %v260_v11  ;;  %v324_v23 = vmax.f32 %v308_v6, %v316_v13 }
 0x11e   :  { %v317_v15 = vmul.f32 0.01, %v309_v10 }
 0x11f   :  { %v318_v16 = vmul.f32 0.01, %v310_v14  ;;  %v264_v17 = vpop.f32.mrb[4].mxu0 }
 0x120   :  { %v325_v19 = vmax.f32 %v309_v10, %v317_v15  ;;  %v311_v20 = vadd.f32 %v300_v12, %v264_v17  ;;  %v266_v21 = vpop.f32.mrb[5].mxu0 }
 0x121   :  { %v312_v22 = vadd.f32 %v300_v12, %v266_v21  ;;  %v326_v24 = vmax.f32 %v310_v14, %v318_v16 }
 0x122   :  { %v812_v25 = vpack.c.bf16 %v325_v19, %v323_v18  ;;  %v319_v29 = vmul.f32 0.01, %v311_v20 }
 0x123   :  { %v270_v27 = vpop.f32.mrb[6].mxu0  ;;  %v810_v28 = vpack.c.bf16 %v326_v24, %v324_v23  ;;  %v320_v32 = vmul.f32 0.01, %v312_v22 }
 0x124   :  { %v313_v30 = vadd.f32 %v305_v26, %v270_v27  ;;  %v272_v31 = vpop.f32.mrb[7].mxu0  ;;  %v327_v36 = vmax.f32 %v311_v20, %v319_v29 }
 0x125   :  { %v314_v33 = vadd.f32 %v305_v26, %v272_v31  ;;  %811 = vmatprep.subr.bf16.mxu1 %v810_v28  ;;  %v328_v38 = vmax.f32 %v312_v22, %v320_v32  ;;  %v58_v26 = vld [vmem:[%s1134_s1 + $0x58] sm:$0xff] }
 0x126   :  { %v321_v34 = vmul.f32 0.01, %v313_v30  ;;  %813 = vmatpush1.bf16.msra.mxu1 %v812_v25  ;;  %v57_v25 = vld [vmem:[%s1134_s1 + $0x50] sm:$0xff] }
 0x127   :  { %v322_v35 = vmul.f32 0.01, %v314_v33  ;;  %v276_v27 = vpop.f32.mrb[8].mxu0 }
 0x128   :  { %v329_v37 = vmax.f32 %v313_v30, %v321_v34  ;;  %v278_v28 = vpop.f32.mrb[9].mxu0  ;;  %v555_v34 = vpop.permute.xlu0 %554 }
 0x129   :  { %v330_v39 = vmax.f32 %v314_v33, %v322_v35 }
 0x12a   :  { %v816_v40 = vpack.c.bf16 %v329_v37, %v327_v36 }
 0x12b   :  { %v814_v41 = vpack.c.bf16 %v330_v39, %v328_v38  ;;  %v282_v29 = vpop.f32.mrb[10].mxu0 }
 0x12c   :  { %v284_v30 = vpop.f32.mrb[11].mxu0 }
 0x12d   :  { %815 = vmatprep.subr.bf16.mxu1 %v814_v41  ;;  %v560_v41 = vpop.permute.xlu1 %559 }
 0x12e   :  { %817 = vmatpush1.bf16.msra.mxu1 %v816_v40 }
 0x131   :  { %711 = vmatmul.mubr.msk.f32.vlgmr.msra.gmra.mrb[0].mxu1 %vm351_vm2, %v53_v42 }
 0x132   :  { %434 = vmatprep.mubr.f32.mxu1 %v864_v1 }
 0x135   :  { %712 = vmatmul.mubr.msk.f32.gmra.mrb[2].mxu1 %vm351_vm2, %v54_v43 }
 0x136   :  { %440 = vmatprep.mubr.f32.mxu1 %v864_v1 }
 0x139   :  { %713 = vmatmul.mubr.msk.f32.gmra.mrb[4].mxu1 %vm351_vm2, %v55_v44 }
 0x13a   :  { %446 = vmatprep.mubr.f32.mxu1 %v864_v1 }
 0x13d   :  { %714 = vmatmul.mubr.msk.f32.gmra.mrb[6].mxu1 %vm351_vm2, %v56_v45 }
 0x13e   :  { %539 = vmatprep.mubr.f32.mxu1 %v864_v1 }
 0x204   :  { %v430_v49 = vpop.f32.mrb[0].mxu1 }
 0x205   :  { %v431_v50 = vadd.f32 %v430_v49, %v334_v48  ;;  %v432_v51 = vpop.f32.mrb[1].mxu1 }
 0x206   :  { %v433_v52 = vadd.f32 %v432_v51, %v334_v48 }
 0x207   :  { %v453_v55 = vmul.f32 0.01, %v431_v50 }
 0x208   :  { %v436_v54 = vpop.f32.mrb[2].mxu1  ;;  %v454_v58 = vmul.f32 0.01, %v433_v52 }
 0x209   :  { %v437_v56 = vadd.f32 %v436_v54, %v339_v53  ;;  %v438_v57 = vpop.f32.mrb[3].mxu1  ;;  %v461_v0 = vmax.f32 %v431_v50, %v453_v55  ;;  %v59_v54 = vld [vmem:[%s1134_s1 + $0x60] sm:$0xf]  ;;  %v577_v55 = vpop.permute.xlu0 %576 }
 0x20a   :  { %v439_v59 = vadd.f32 %v438_v57, %v339_v53  ;;  %v462_v5 = vmax.f32 %v433_v52, %v454_v58 }
 0x20b   :  { %v455_v60 = vmul.f32 0.01, %v437_v56 }
 0x20c   :  { %v456_v62 = vmul.f32 0.01, %v439_v59  ;;  %v442_v63 = vpop.f32.mrb[4].mxu1 }
 0x20d   :  { %v463_v2 = vmax.f32 %v437_v56, %v455_v60  ;;  %v443_v3 = vadd.f32 %v442_v63, %v344_v61  ;;  %v444_v4 = vpop.f32.mrb[5].mxu1 }
 0x20e   :  { %v464_v6 = vmax.f32 %v439_v59, %v456_v62  ;;  %v445_v7 = vadd.f32 %v444_v4, %v344_v61 }
 0x20f   :  { %v820_v8 = vpack.c.bf16 %v463_v2, %v461_v0  ;;  %v457_v12 = vmul.f32 0.01, %v443_v3 }
 0x210   :  { %v448_v10 = vpop.f32.mrb[6].mxu1  ;;  %v818_v11 = vpack.c.bf16 %v464_v6, %v462_v5  ;;  %v458_v15 = vmul.f32 0.01, %v445_v7 }
 0x211   :  { %v449_v13 = vadd.f32 %v448_v10, %v349_v9  ;;  %v450_v14 = vpop.f32.mrb[7].mxu1  ;;  %v465_v19 = vmax.f32 %v443_v3, %v457_v12 }
 0x212   :  { %v451_v16 = vadd.f32 %v450_v14, %v349_v9  ;;  %819 = vmatprep.subr.bf16.mxu1 %v818_v11  ;;  %v466_v21 = vmax.f32 %v445_v7, %v458_v15 }
 0x213   :  { %v459_v17 = vmul.f32 0.01, %v449_v13  ;;  %821 = vmatpush1.bf16.msra.mxu1 %v820_v8 }
 0x214   :  { %v460_v18 = vmul.f32 0.01, %v451_v16 }
 0x215   :  { %v467_v20 = vmax.f32 %v449_v13, %v459_v17 }
 0x216   :  { %v468_v22 = vmax.f32 %v451_v16, %v460_v18 }
 0x217   :  { %v824_v23 = vpack.c.bf16 %v467_v20, %v465_v19 }
 0x218   :  { %v822_v24 = vpack.c.bf16 %v468_v22, %v466_v21 }
 0x21a   :  { %823 = vmatprep.subr.bf16.mxu1 %v822_v24 }
 0x21b   :  { %825 = vmatpush1.bf16.msra.mxu1 %v824_v23 }
 0x21e   :  { %715 = vmatmul.mubr.msk.f32.vlgmr.msra.gmra.mrb[8].mxu1 %vm351_vm2, %v57_v25 }
 0x21f   :  { %545 = vmatprep.mubr.f32.mxu1 %v864_v1 }
 0x222   :  { %716 = vmatmul.mubr.msk.f32.gmra.mrb[10].mxu1 %vm351_vm2, %v58_v26 }
 0x223   :  { %647 = vmatprep.mubr.f32.mxu1 %v864_v1 }
 0x2f1   :  { %v541_v31 = vpop.f32.mrb[8].mxu1 }
 0x2f2   :  { %v542_v32 = vadd.f32 %v541_v31, %v276_v27  ;;  %v543_v33 = vpop.f32.mrb[9].mxu1 }
 0x2f3   :  { %v544_v35 = vadd.f32 %v543_v33, %v278_v28 }
 0x2f4   :  { %v562_v36 = vadd.f32 %v555_v34, %v542_v32 }
 0x2f5   :  { %v563_v37 = vadd.f32 %v555_v34, %v544_v35  ;;  %v547_v38 = vpop.f32.mrb[10].mxu1 }
 0x2f6   :  { %v548_v39 = vadd.f32 %v547_v38, %v282_v29  ;;  %v549_v40 = vpop.f32.mrb[11].mxu1  ;;  %v566_v43 = vmul.f32 0.01, %v562_v36 }
 0x2f7   :  { %v550_v42 = vadd.f32 %v549_v40, %v284_v30  ;;  %v567_v45 = vmul.f32 0.01, %v563_v37 }
 0x2f8   :  { %v564_v44 = vadd.f32 %v560_v41, %v548_v39  ;;  %v570_v48 = vmax.f32 %v562_v36, %v566_v43 }
 0x2f9   :  { %v565_v1 = vadd.f32 %v560_v41, %v550_v42  ;;  %v571_v50 = vmax.f32 %v563_v37, %v567_v45 }
 0x2fa   :  { %v568_v46 = vmul.f32 0.01, %v564_v44 }
 0x2fb   :  { %v569_v47 = vmul.f32 0.01, %v565_v1 }
 0x2fc   :  { %v572_v49 = vmax.f32 %v564_v44, %v568_v46 }
 0x2fd   :  { %v573_v51 = vmax.f32 %v565_v1, %v569_v47 }
 0x2fe   :  { %v828_v52 = vpack.c.bf16 %v572_v49, %v570_v48 }
 0x2ff   :  { %v826_v53 = vpack.c.bf16 %v573_v51, %v571_v50 }
 0x301   :  { %827 = vmatprep.subr.bf16.mxu1 %v826_v53 }
 0x302   :  { %829 = vmatpush1.bf16.msra.mxu1 %v828_v52 }
 0x305   :  { %717 = vmatmul.mubr.msk.f32.vlgmr.msra.gmra.mrb[12].mxu1 %vm579_vm3, %v59_v54 }
 0x3d8   :  { %v649_v56 = vpop.f32.mrb[12].mxu1 }
 0x3d9   :  { %v650_v57 = vadd.f32 %v649_v56, %v577_v55  ;;  %v651_v58 = vpop.f32.mrb[13].mxu1 }
 0x3da   :  { %v652_v59 = vadd.f32 %v651_v58, %v577_v55 }
 0x3dc   :  { %v656_v60 = vcombine.low %v650_v57, %v652_v59 }
 0x3de   :  { %658 = vst [vmem:[#allocation2] sm:$0xff] %v656_v60 }
 0x3df   :  { %850 = shalt.err (!%p847_p4)
}
 0x3e0   :  { %s851_s17 = scalar_lea.hbm %s1136_s3, 128 }
 0x3e1   :  { %p852_p5 = scmp.ne.s32.totalorder %s1136_s3, %s851_s17  ;;  %p855_p6 = scmp.lt.u32.totalorder %s851_s17, %s1136_s3 }
 0x3e3   :  { %p857_p7 = pnand %p855_p6, %p852_p5 }
 0x3e5   :  { %860 = shalt.err (!%p857_p7)
}
 0x3e6   :  { %668 = dma.vmem_to_hbm [thread:$0]  %s666_s14, 128, %s1136_s3, [#allocation3]  }
 0x3e7   :  { %861 = dma.done.wait [#allocation3], 128  }
 0x3e8   :  { %862 = vsyncadd [#allocation3], 4294967168 }
 0x3e9   :  { %672 = vsyncpa [#allocation3], 1 }

</bundles_post_ra>
